<compile_context>
chip_gen: v5e
topology: v5e:2x2
jax: 0.10.0
libtpu: 0.0.40
codegen_flags: <defaults>
</compile_context>

<pallas_src>
import jax
import jax.numpy as jnp
from jax.experimental import pallas as pl
from jax.experimental.pallas import tpu as pltpu

EPS = 1e-5
SLOPE = 0.01  # torch.nn.LeakyReLU default negative_slope


def _leaky_relu(x):
    return jnp.where(x > 0, x, SLOPE * x)


def encoder_kernel(x_ref, w1_ref, ws_ref, vec_ref, wh_ref, bh_ref, out_ref):
    """Fused Encoder_NVLDA forward for one (TILE_B, num_input) batch tile.

    vec_ref[k] holds (bias, bn_scale, bn_shift) rows for layer k
    (k=0 -> Linear_block, k=1.. -> skip blocks).
    """
    x = x_ref[...]

    # ---- Linear_block: fc -> LeakyReLU -> (dropout=id) -> folded BN ----
    v = vec_ref[0]                                     # (3, H)
    h = jnp.dot(x, w1_ref[...], preferred_element_type=jnp.float32)
    h = _leaky_relu(h + v[0:1, :])
    h = h * v[1:2, :] + v[2:3, :]

    # ---- n_skip_layers x Linear_skip_block (per-iteration ref reads) ----
    n_layers = ws_ref.shape[0]
    for l in range(n_layers):                          # static, small trip count
        v = vec_ref[l + 1]                             # (3, H)
        h0 = h
        h = jnp.dot(h0, ws_ref[l], preferred_element_type=jnp.float32)
        h = _leaky_relu(h + v[0:1, :])
        h = h0 + h
        h = h * v[1:2, :] + v[2:3, :]

    # ---- fused mean|logvar head: single lane-dense (TILE_B, 2*T) store ----
    out_ref[...] = (
        jnp.dot(h, wh_ref[...], preferred_element_type=jnp.float32) + bh_ref[...]
    )


def _fold_bn(gamma, beta, rmean, rvar):
    s = gamma * jax.lax.rsqrt(rvar + EPS)
    t = beta - rmean * s
    return s, t


def encoder_nvlda_forward(x, params, *, tile_b=8):
    batch, num_input = x.shape
    n_hidden = params["w1"].shape[1]
    n_topics = params["wm"].shape[1]
    n_skip = params["ws"].shape[0]
    n_out = 2 * n_topics

    # --- fold BN(eval) into scale/shift and pack all per-layer vectors ---
    s1, t1 = _fold_bn(params["g1"], params["be1"], params["rm1"], params["rv1"])
    ss, ts = _fold_bn(params["gs"], params["bes"], params["rms"], params["rvs"])
    vec0 = jnp.stack([params["b1"][0], s1[0], t1[0]])[None]          # (1, 3, H)
    vecs = jnp.concatenate([params["bs"], ss, ts], axis=1)           # (L, 3, H)
    vec_all = jnp.concatenate([vec0, vecs], axis=0).astype(jnp.float32)

    # --- fuse mean/logvar heads into one lane-dense matmul ---
    wh = jnp.concatenate([params["wm"], params["wl"]], axis=1)       # (H, 2T)
    bh = jnp.concatenate([params["bm"], params["bl"]], axis=1)       # (1, 2T)

    # --- pad batch to a tile multiple (eval-mode: rows are independent) ---
    pad = (-batch) % tile_b
    if pad:
        x = jnp.concatenate([x, jnp.zeros((pad, num_input), x.dtype)], axis=0)
    padded_b = batch + pad
    grid = (padded_b // tile_b,)

    flops = 2 * padded_b * (
        num_input * n_hidden + n_skip * n_hidden * n_hidden + n_hidden * n_out
    )
    bytes_accessed = 4 * (
        padded_b * (num_input + n_out)
        + num_input * n_hidden
        + n_skip * n_hidden * n_hidden
        + n_hidden * n_out
        + (n_skip + 1) * 3 * n_hidden
        + n_out
    )

    out = pl.pallas_call(
        encoder_kernel,
        out_shape=jax.ShapeDtypeStruct((padded_b, n_out), jnp.float32),
        grid_spec=pltpu.PrefetchScalarGridSpec(
            num_scalar_prefetch=0,
            grid=grid,
            in_specs=[
                # streamed activation tiles
                pl.BlockSpec((tile_b, num_input), lambda i: (i, 0)),
                # VMEM-resident weights / packed vectors (same block every step)
                pl.BlockSpec((num_input, n_hidden), lambda i: (0, 0)),
                pl.BlockSpec((n_skip, n_hidden, n_hidden), lambda i: (0, 0, 0)),
                pl.BlockSpec((n_skip + 1, 3, n_hidden), lambda i: (0, 0, 0)),
                pl.BlockSpec((n_hidden, n_out), lambda i: (0, 0)),
                pl.BlockSpec((1, n_out), lambda i: (0, 0)),
            ],
            out_specs=pl.BlockSpec((tile_b, n_out), lambda i: (i, 0)),
        ),
        compiler_params=pltpu.CompilerParams(
            dimension_semantics=("parallel",),
        ),
        cost_estimate=pl.CostEstimate(
            flops=flops, transcendentals=0, bytes_accessed=bytes_accessed
        ),
    )(
        x.astype(jnp.float32),
        params["w1"],
        params["ws"],
        vec_all,
        wh,
        bh,
    )

    out = out[:batch]
    return out[:, :n_topics], out[:, n_topics:]


# ----------------------------- reference & params -----------------------------

def _bn_eval(x, gamma, beta, rmean, rvar):
    return (x - rmean) * jax.lax.rsqrt(rvar + EPS) * gamma + beta


def reference_forward(x, p):
    h = x @ p["w1"] + p["b1"]
    h = _leaky_relu(h)
    h = _bn_eval(h, p["g1"], p["be1"], p["rm1"], p["rv1"])
    for l in range(p["ws"].shape[0]):
        h0 = h
        h = _leaky_relu(h0 @ p["ws"][l] + p["bs"][l])
        h = h0 + h
        h = _bn_eval(h, p["gs"][l], p["bes"][l], p["rms"][l], p["rvs"][l])
    return h @ p["wm"] + p["bm"], h @ p["wl"] + p["bl"]


def make_params(key, num_input, n_hidden, n_topics, n_skip_layers):
    ks = jax.random.split(key, 12)
    f32 = jnp.float32
    params = {
        # Linear_block
        "w1": jax.random.normal(ks[0], (num_input, n_hidden), f32) * 0.05,
        "b1": jax.random.normal(ks[1], (1, n_hidden), f32) * 0.05,
        "g1": 1.0 + 0.1 * jax.random.normal(ks[2], (1, n_hidden), f32),
        "be1": 0.1 * jax.random.normal(ks[3], (1, n_hidden), f32),
        "rm1": 0.1 * jax.random.normal(ks[4], (1, n_hidden), f32),
        "rv1": 1.0 + 0.1 * jnp.abs(jax.random.normal(ks[5], (1, n_hidden), f32)),
        # stacked skip blocks
        "ws": jax.random.normal(ks[6], (n_skip_layers, n_hidden, n_hidden), f32) * 0.05,
        "bs": jax.random.normal(ks[7], (n_skip_layers, 1, n_hidden), f32) * 0.05,
        "gs": 1.0 + 0.1 * jax.random.normal(ks[8], (n_skip_layers, 1, n_hidden), f32),
        "bes": 0.1 * jax.random.normal(ks[9], (n_skip_layers, 1, n_hidden), f32),
        "rms": 0.1 * jax.random.normal(ks[10], (n_skip_layers, 1, n_hidden), f32),
        "rvs": 1.0 + 0.1 * jnp.abs(
            jax.random.normal(ks[11], (n_skip_layers, 1, n_hidden), f32)
        ),
    }
    kh = jax.random.split(jax.random.fold_in(key, 123), 4)
    params["wm"] = jax.random.normal(kh[0], (n_hidden, n_topics), f32) * 0.05
    params["bm"] = jax.random.normal(kh[1], (1, n_topics), f32) * 0.05
    params["wl"] = jax.random.normal(kh[2], (n_hidden, n_topics), f32) * 0.05
    params["bl"] = jax.random.normal(kh[3], (1, n_topics), f32) * 0.05
    return params


if __name__ == "__main__":
    # config: num_input=256, n_hidden_block=128, n_topics=64, n_skip_layers=2
    batch, num_input, n_hidden, n_topics, n_skip = 16, 256, 128, 64, 2

    key = jax.random.PRNGKey(0)
    kx, kp = jax.random.split(key)
    x = jax.random.normal(kx, (batch, num_input), jnp.float32)
    params = make_params(kp, num_input, n_hidden, n_topics, n_skip)

    mean, logvar = encoder_nvlda_forward(x, params, tile_b=8)
    jax.block_until_ready((mean, logvar))

    ref_mean, ref_logvar = reference_forward(x, params)
    assert mean.shape == ref_mean.shape and logvar.shape == ref_logvar.shape
    assert jnp.allclose(mean, ref_mean, atol=1e-4, rtol=1e-4)
    assert jnp.allclose(logvar, ref_logvar, atol=1e-4, rtol=1e-4)

    print("KERNEL_OK")
</pallas_src>

<mosaic_0001>
module attributes {stable_mosaic.version = 11 : i64} {
  func.func @encoder_kernel(%arg0: i32, %arg1: memref<8x256xf32, #tpu.memory_space<vmem>>, %arg2: memref<256x128xf32, #tpu.memory_space<vmem>>, %arg3: memref<2x128x128xf32, #tpu.memory_space<vmem>>, %arg4: memref<3x3x128xf32, #tpu.memory_space<vmem>>, %arg5: memref<128x128xf32, #tpu.memory_space<vmem>>, %arg6: memref<1x128xf32, #tpu.memory_space<vmem>>, %arg7: memref<8x128xf32, #tpu.memory_space<vmem>>) attributes {dimension_semantics = [#tpu.dimension_semantics<parallel>], iteration_bounds = array<i64: 2>, scalar_prefetch = 0 : i64, scratch_operands = 0 : i64, tpu.core_type = #tpu.core_type<tc>, window_params = [{transform_indices = @transform_0, window_bounds = array<i64: 8, 256>}, {pipeline_mode = #tpu.pipeline_mode<synchronous>, transform_indices = @transform_1, window_bounds = array<i64: 256, 128>}, {pipeline_mode = #tpu.pipeline_mode<synchronous>, transform_indices = @transform_2, window_bounds = array<i64: 2, 128, 128>}, {pipeline_mode = #tpu.pipeline_mode<synchronous>, transform_indices = @transform_3, window_bounds = array<i64: 3, 3, 128>}, {pipeline_mode = #tpu.pipeline_mode<synchronous>, transform_indices = @transform_4, window_bounds = array<i64: 128, 128>}, {pipeline_mode = #tpu.pipeline_mode<synchronous>, transform_indices = @transform_5, window_bounds = array<i64: 1, 128>}, {transform_indices = @transform_6, window_bounds = array<i64: 8, 128>}]} {
    %c0 = arith.constant 0 : index
    %c0_0 = arith.constant 0 : index
    %0 = vector.load %arg1[%c0, %c0_0] : memref<8x256xf32, #tpu.memory_space<vmem>>, vector<8x256xf32>
    %c0_1 = arith.constant 0 : index
    %c0_2 = arith.constant 0 : index
    %c0_3 = arith.constant 0 : index
    %1 = vector.load %arg4[%c0_1, %c0_2, %c0_3] : memref<3x3x128xf32, #tpu.memory_space<vmem>>, vector<1x3x128xf32>
    %2 = vector.shape_cast %1 : vector<1x3x128xf32> to vector<3x128xf32>
    %c0_4 = arith.constant 0 : index
    %c0_5 = arith.constant 0 : index
    %3 = vector.load %arg2[%c0_4, %c0_5] : memref<256x128xf32, #tpu.memory_space<vmem>>, vector<256x128xf32>
    %cst = arith.constant dense<0.000000e+00> : vector<8x128xf32>
    %4 = tpu.matmul %0, %3, %cst {dimension_numbers = #tpu.dot_dimension_numbers<[1], [0], [0], [1], [0, 0, 1, 1], [], []>} : vector<8x256xf32>, vector<256x128xf32>, vector<8x128xf32> -> vector<8x128xf32>
    %5 = vector.extract_strided_slice %2 {offsets = [0, 0], sizes = [1, 128], strides = [1, 1]} : vector<3x128xf32> to vector<1x128xf32>
    %6 = vector.broadcast %5 : vector<1x128xf32> to vector<8x128xf32>
    %7 = arith.addf %4, %6 : vector<8x128xf32>
    %cst_6 = arith.constant 0.000000e+00 : f32
    %8 = vector.broadcast %cst_6 : f32 to vector<8x128xf32>
    %9 = arith.cmpf ogt, %7, %8 : vector<8x128xf32>
    %cst_7 = arith.constant 0.00999999977 : f32
    %10 = vector.broadcast %cst_7 : f32 to vector<8x128xf32>
    %11 = arith.mulf %10, %7 : vector<8x128xf32>
    %12 = arith.select %9, %7, %11 : vector<8x128xi1>, vector<8x128xf32>
    %13 = vector.extract_strided_slice %2 {offsets = [1, 0], sizes = [1, 128], strides = [1, 1]} : vector<3x128xf32> to vector<1x128xf32>
    %14 = vector.broadcast %13 : vector<1x128xf32> to vector<8x128xf32>
    %15 = arith.mulf %12, %14 : vector<8x128xf32>
    %16 = vector.extract_strided_slice %2 {offsets = [2, 0], sizes = [1, 128], strides = [1, 1]} : vector<3x128xf32> to vector<1x128xf32>
    %17 = vector.broadcast %16 : vector<1x128xf32> to vector<8x128xf32>
    %18 = arith.addf %15, %17 : vector<8x128xf32>
    %c1 = arith.constant 1 : index
    %c0_8 = arith.constant 0 : index
    %c0_9 = arith.constant 0 : index
    %19 = vector.load %arg4[%c1, %c0_8, %c0_9] : memref<3x3x128xf32, #tpu.memory_space<vmem>>, vector<1x3x128xf32>
    %20 = vector.shape_cast %19 : vector<1x3x128xf32> to vector<3x128xf32>
    %c0_10 = arith.constant 0 : index
    %c0_11 = arith.constant 0 : index
    %c0_12 = arith.constant 0 : index
    %21 = vector.load %arg3[%c0_10, %c0_11, %c0_12] : memref<2x128x128xf32, #tpu.memory_space<vmem>>, vector<1x128x128xf32>
    %22 = vector.shape_cast %21 : vector<1x128x128xf32> to vector<128x128xf32>
    %cst_13 = arith.constant dense<0.000000e+00> : vector<8x128xf32>
    %23 = tpu.matmul %18, %22, %cst_13 {dimension_numbers = #tpu.dot_dimension_numbers<[1], [0], [0], [1], [0, 0, 1, 1], [], []>} : vector<8x128xf32>, vector<128x128xf32>, vector<8x128xf32> -> vector<8x128xf32>
    %24 = vector.extract_strided_slice %20 {offsets = [0, 0], sizes = [1, 128], strides = [1, 1]} : vector<3x128xf32> to vector<1x128xf32>
    %25 = vector.broadcast %24 : vector<1x128xf32> to vector<8x128xf32>
    %26 = arith.addf %23, %25 : vector<8x128xf32>
    %cst_14 = arith.constant 0.000000e+00 : f32
    %27 = vector.broadcast %cst_14 : f32 to vector<8x128xf32>
    %28 = arith.cmpf ogt, %26, %27 : vector<8x128xf32>
    %cst_15 = arith.constant 0.00999999977 : f32
    %29 = vector.broadcast %cst_15 : f32 to vector<8x128xf32>
    %30 = arith.mulf %29, %26 : vector<8x128xf32>
    %31 = arith.select %28, %26, %30 : vector<8x128xi1>, vector<8x128xf32>
    %32 = arith.addf %18, %31 : vector<8x128xf32>
    %33 = vector.extract_strided_slice %20 {offsets = [1, 0], sizes = [1, 128], strides = [1, 1]} : vector<3x128xf32> to vector<1x128xf32>
    %34 = vector.broadcast %33 : vector<1x128xf32> to vector<8x128xf32>
    %35 = arith.mulf %32, %34 : vector<8x128xf32>
    %36 = vector.extract_strided_slice %20 {offsets = [2, 0], sizes = [1, 128], strides = [1, 1]} : vector<3x128xf32> to vector<1x128xf32>
    %37 = vector.broadcast %36 : vector<1x128xf32> to vector<8x128xf32>
    %38 = arith.addf %35, %37 : vector<8x128xf32>
    %c2 = arith.constant 2 : index
    %c0_16 = arith.constant 0 : index
    %c0_17 = arith.constant 0 : index
    %39 = vector.load %arg4[%c2, %c0_16, %c0_17] : memref<3x3x128xf32, #tpu.memory_space<vmem>>, vector<1x3x128xf32>
    %40 = vector.shape_cast %39 : vector<1x3x128xf32> to vector<3x128xf32>
    %c1_18 = arith.constant 1 : index
    %c0_19 = arith.constant 0 : index
    %c0_20 = arith.constant 0 : index
    %41 = vector.load %arg3[%c1_18, %c0_19, %c0_20] : memref<2x128x128xf32, #tpu.memory_space<vmem>>, vector<1x128x128xf32>
    %42 = vector.shape_cast %41 : vector<1x128x128xf32> to vector<128x128xf32>
    %cst_21 = arith.constant dense<0.000000e+00> : vector<8x128xf32>
    %43 = tpu.matmul %38, %42, %cst_21 {dimension_numbers = #tpu.dot_dimension_numbers<[1], [0], [0], [1], [0, 0, 1, 1], [], []>} : vector<8x128xf32>, vector<128x128xf32>, vector<8x128xf32> -> vector<8x128xf32>
    %44 = vector.extract_strided_slice %40 {offsets = [0, 0], sizes = [1, 128], strides = [1, 1]} : vector<3x128xf32> to vector<1x128xf32>
    %45 = vector.broadcast %44 : vector<1x128xf32> to vector<8x128xf32>
    %46 = arith.addf %43, %45 : vector<8x128xf32>
    %cst_22 = arith.constant 0.000000e+00 : f32
    %47 = vector.broadcast %cst_22 : f32 to vector<8x128xf32>
    %48 = arith.cmpf ogt, %46, %47 : vector<8x128xf32>
    %cst_23 = arith.constant 0.00999999977 : f32
    %49 = vector.broadcast %cst_23 : f32 to vector<8x128xf32>
    %50 = arith.mulf %49, %46 : vector<8x128xf32>
    %51 = arith.select %48, %46, %50 : vector<8x128xi1>, vector<8x128xf32>
    %52 = arith.addf %38, %51 : vector<8x128xf32>
    %53 = vector.extract_strided_slice %40 {offsets = [1, 0], sizes = [1, 128], strides = [1, 1]} : vector<3x128xf32> to vector<1x128xf32>
    %54 = vector.broadcast %53 : vector<1x128xf32> to vector<8x128xf32>
    %55 = arith.mulf %52, %54 : vector<8x128xf32>
    %56 = vector.extract_strided_slice %40 {offsets = [2, 0], sizes = [1, 128], strides = [1, 1]} : vector<3x128xf32> to vector<1x128xf32>
    %57 = vector.broadcast %56 : vector<1x128xf32> to vector<8x128xf32>
    %58 = arith.addf %55, %57 : vector<8x128xf32>
    %c0_24 = arith.constant 0 : index
    %c0_25 = arith.constant 0 : index
    %59 = vector.load %arg5[%c0_24, %c0_25] : memref<128x128xf32, #tpu.memory_space<vmem>>, vector<128x128xf32>
    %cst_26 = arith.constant dense<0.000000e+00> : vector<8x128xf32>
    %60 = tpu.matmul %58, %59, %cst_26 {dimension_numbers = #tpu.dot_dimension_numbers<[1], [0], [0], [1], [0, 0, 1, 1], [], []>} : vector<8x128xf32>, vector<128x128xf32>, vector<8x128xf32> -> vector<8x128xf32>
    %c0_27 = arith.constant 0 : index
    %c0_28 = arith.constant 0 : index
    %61 = vector.load %arg6[%c0_27, %c0_28] : memref<1x128xf32, #tpu.memory_space<vmem>>, vector<1x128xf32>
    %62 = vector.broadcast %61 : vector<1x128xf32> to vector<8x128xf32>
    %63 = arith.addf %60, %62 : vector<8x128xf32>
    %c0_29 = arith.constant 0 : index
    %c0_30 = arith.constant 0 : index
    %64 = vector.load %arg7[%c0_29, %c0_30] : memref<8x128xf32, #tpu.memory_space<vmem>>, vector<8x128xf32>
    tpu.vector_store %arg7[%c0_29, %c0_30], %63 {strides = array<i32>} : memref<8x128xf32, #tpu.memory_space<vmem>>, vector<8x128xf32>,
    return
  }
  func.func @transform_0(%arg0: i32) -> (i32, i32) {
    %c0_i32 = arith.constant 0 : i32
    %c0_i32_0 = arith.constant 0 : i32
    return %arg0, %c0_i32 : i32, i32
  }
  func.func @transform_1(%arg0: i32) -> (i32, i32) {
    %c0_i32 = arith.constant 0 : i32
    %c0_i32_0 = arith.constant 0 : i32
    %c0_i32_1 = arith.constant 0 : i32
    return %c0_i32, %c0_i32_0 : i32, i32
  }
  func.func @transform_2(%arg0: i32) -> (i32, i32, i32) {
    %c0_i32 = arith.constant 0 : i32
    %c0_i32_0 = arith.constant 0 : i32
    %c0_i32_1 = arith.constant 0 : i32
    %c0_i32_2 = arith.constant 0 : i32
    return %c0_i32, %c0_i32_0, %c0_i32_1 : i32, i32, i32
  }
  func.func @transform_3(%arg0: i32) -> (i32, i32, i32) {
    %c0_i32 = arith.constant 0 : i32
    %c0_i32_0 = arith.constant 0 : i32
    %c0_i32_1 = arith.constant 0 : i32
    %c0_i32_2 = arith.constant 0 : i32
    return %c0_i32, %c0_i32_0, %c0_i32_1 : i32, i32, i32
  }
  func.func @transform_4(%arg0: i32) -> (i32, i32) {
    %c0_i32 = arith.constant 0 : i32
    %c0_i32_0 = arith.constant 0 : i32
    %c0_i32_1 = arith.constant 0 : i32
    return %c0_i32, %c0_i32_0 : i32, i32
  }
  func.func @transform_5(%arg0: i32) -> (i32, i32) {
    %c0_i32 = arith.constant 0 : i32
    %c0_i32_0 = arith.constant 0 : i32
    %c0_i32_1 = arith.constant 0 : i32
    return %c0_i32, %c0_i32_0 : i32, i32
  }
  func.func @transform_6(%arg0: i32) -> (i32, i32) {
    %c0_i32 = arith.constant 0 : i32
    %c0_i32_0 = arith.constant 0 : i32
    return %arg0, %c0_i32 : i32, i32
  }
}

</mosaic_0001>

<bundles_post_ra>
// kernel: tpu_custom_call.1
= control target key start
LH: loop header
LB: loop body
LE: loop exit
PB: predicated region body
PF: predicated region fallthrough
CT: control target
= control target key end

     0   :  { %s1237_s0 = inlined_call_operand.hbm [shape: f32[16,256], index: 0, kind: input, shape index: {}]   ;;  %s1238_s1 = inlined_call_operand.hbm [shape: f32[256,128], index: 1, kind: input, shape index: {}]   ;;  %s1239_s2 = inlined_call_operand.hbm [shape: f32[2,128,128], index: 2, kind: input, shape index: {}]   ;;  %s1240_s3 = inlined_call_operand.hbm [shape: f32[3,3,128], index: 3, kind: input, shape index: {}]   ;;  %s1241_s4 = inlined_call_operand.hbm [shape: f32[128,128], index: 4, kind: input, shape index: {}]   ;;  %s1242_s5 = inlined_call_operand.vmem [shape: f32[1,128], index: 5, kind: input, shape index: {}]   ;;  %s1243_s6 = inlined_call_operand.hbm [shape: f32[16,128], index: 6, kind: output, shape index: {}]  }
   0x1   :  { %1244 = sst [smem:[#allocation16_spill]] %s1238_s1 }
   0x2   :  { %11 = vsyncpa [#allocation3], 0 }
   0x3   :  { %13 = vsyncpa [#allocation3 + $0x1], 0 }
   0x4   :  { %14 = vsyncpa [#allocation6], 0 }
   0x5   :  { %15 = vsyncpa [#allocation9], 0 }
   0x6   :  { %16 = vsyncpa [#allocation4], 0 }
   0x7   :  { %18 = vsyncpa [#allocation4 + $0x1], 0  ;;  %s1062_s21 = smov 0   ;;  %s1064_s22 = smov 0  }
   0x8   :  { %s1066_s23 = smov 0   ;;  %s1068_s24 = smov 0  }
   0x9 LB: > { %s1245_s1 = sld [smem:[#allocation16_spill]]  ;;  %s1086_s28 = sadd.s32 4294967295, %s1017_s24   ;;  %s1017_s24 = sphi %s1068_s24, %s1257_s24   ;;  %s1013_s23 = sphi %s1066_s23, %s1256_s23   ;;  %s1009_s22 = sphi %s1064_s22, %s1255_s22   ;;  %s1005_s21 = sphi %s1062_s21, %s1254_s21  }
   0xa   : > { %p680_p0 = scmp.ge.s32.totalorder %s1017_s24, 1  ;;  %p45_p1 = scmp.eq.s32.totalorder %s1086_s28, 0 }
   0xb   : > { %p186_p2 = scmp.lt.s32.totalorder %s1017_s24, 3  ;;  %s1019_s30 = smov [#allocation5]  }
   0xc   : > { %s199_s7 = sshll.u32 %s1019_s30, 4  ;;  %s225_s10 = sshll.u32 %s1240_s3, 4  ;;  %s200_s7 = int_to_ptr.vmem [resolvable:$true] %s199_s7  ;;  %s226_s10 = int_to_ptr.hbm [resolvable:$true] %s225_s10 }
   0xd   : > { %p1091_p3 = pnand %p680_p0, %p186_p2  ;;  %s1020_s12 = smov [#allocation8]  }
   0xe   : > { %s227_s13 = sshll.u32 %s1020_s12, 4  ;;  %s1021_s14 = smov 128   ;;  %s228_s13 = int_to_ptr.vmem [resolvable:$true] %s227_s13 }
   0xf   : > { %s197_s27 = sshll.u32 %s1245_s1, 4  ;;  %p721_p4 = pneg %p1091_p3  ;;  %s198_s27 = int_to_ptr.hbm [resolvable:$true] %s197_s27 }
  0x10   : > { %s1022_s15 = smov 8   ;;  %s1023_s16 = smov 64  }
  0x11   : > { %p1103_p6 = pnand %p721_p4, %p45_p1  ;;  %s1024_s17 = smov 4  }
  0x12   : > { %s211_s20 = sshll.u32 %s1239_s2, 4  ;;  %s1025_s25 = smov [#allocation7]   ;;  %s212_s20 = int_to_ptr.hbm [resolvable:$true] %s211_s20 }
  0x13   : > { %724 = dma.hbm_to_vmem [thread:$0]  (!%p1103_p6), %s198_s27, 4096, %s200_s7, [#allocation6], %s1021_s14, %s1021_s14, %s1022_s15  }
  0x14   : > { %730 = dma.hbm_to_vmem [thread:$0]  (!%p1103_p6), %s226_s10, 192, %s228_s13, [#allocation9], %s1023_s16, %s1023_s16, %s1024_s17  }
  0x15   : > { %s213_s26 = sshll.u32 %s1025_s25, 4  ;;  %s239_s7 = sshll.u32 %s1241_s4, 4  ;;  %s214_s26 = int_to_ptr.vmem [resolvable:$true] %s213_s26  ;;  %s240_s7 = int_to_ptr.hbm [resolvable:$true] %s239_s7 }
  0x16   : > { %727 = dma.hbm_to_vmem [thread:$0]  (!%p1103_p6), %s212_s20, 4096, %s214_s26, [#allocation6], %s1021_s14, %s1021_s14, %s1022_s15  }
  0x17   : > { %s1026_s8 = smov [#allocation10]   ;;  %s679_s10 = sadd.s32 4294967294, %s1017_s24  }
  0x18   : > { %s241_s9 = sshll.u32 %s1026_s8, 4  ;;  %s1123_s12 = sadd.s32 1, %s1017_s24   ;;  %s242_s9 = int_to_ptr.vmem [resolvable:$true] %s241_s9 }
  0x19   : > { %733 = dma.hbm_to_vmem [thread:$0]  (!%p1103_p6), %s240_s7, 2048, %s242_s9, [#allocation9], %s1021_s14, %s1021_s14, %s1022_s15  }
  0x1a   : > { %s28_s13 = ssub.s32 %s1017_s24, %s1123_s12  ;;  %s31_s16 = sadd.s32 1, %s1013_s23 }
  0x1b   : > { %p29_p7 = scmp.eq.s32.totalorder %s28_s13, 0  ;;  %p38_p8 = scmp.ne.s32.totalorder %s1013_s23, %s1009_s22 }
  0x1c   : > { %p39_p9 = scmp.eq.s32.totalorder %s1017_s24, 0  ;;  %p44_p10 = scmp.ne.s32.totalorder %s1009_s22, %s1005_s21 }
  0x1d   : > { %s1134_s17 = scalar_select %p29_p7, %s1013_s23, %s31_s16  }
  0x1e   : > { %p1136_p11 = por %p39_p9, %p38_p8  ;;  %p1142_p12 = por %p45_p1, %p44_p10 }
  0x1f   : > { %p173_p13 = scmp.eq.s32.totalorder %s1086_s28, 1  ;;  %p179_p0 = scmp.eq.s32.totalorder %s679_s10, 1 }
  0x20   : > { %p746_p2 = scmp.lt.s32.totalorder %s1017_s24, 2  ;;  %s258_s14 = sand.u32 1, %s1013_s23  }
  0x21   : > { %p1149_p4 = por %p173_p13, %p38_p8  ;;  %p1153_p6 = por %p179_p0, %p44_p10 }
  0x22   : > { %s686_s20 = sshll.u32 %s258_s14, 4  ;;  %s700_s25 = sshll.u32 %s1017_s24, 4 }
  0x23   : > { %s267_s30 = scalar_lea.hbm %s1237_s0, %s700_s25  ;;  %s262_s7 = scalar_lea.vmem [#allocation2], %s686_s20 }
  0x24   : > { %s271_s8 = sshll.u32 %s262_s7, 4  ;;  %s269_s9 = sshll.u32 %s267_s30, 4  ;;  %s272_s8 = int_to_ptr.vmem [resolvable:$true] %s271_s8  ;;  %s270_s9 = int_to_ptr.hbm [resolvable:$true] %s269_s9 }
  0x25   : > { %p1163_p7 = pnand %p746_p2, %p1136_p11  ;;  %s259_s13 = scalar_lea.sflag [#allocation3], %s258_s14 }
  0x26   : > { %s913_s16 = sshra.s32 %s270_s9, 4  ;;  %s920_s26 = scalar_lea.hbm %s1237_s0, 32  ;;  %s914_s16 = int_to_ptr.hbm [resolvable:$true] %s913_s16 }
  0x27   : > { %s915_s1 = scalar_lea.hbm %s914_s16, 16  ;;  %p917_p9 = pneg %p1163_p7 }
  0x28   : > { %p916_p8 = scmp.ne.s32.totalorder %s914_s16, %s915_s1  ;;  %p921_p11 = scmp.lt.s32.totalorder %s914_s16, %s1237_s0 }
  0x29   : > { %p922_p0 = scmp.lt.s32.totalorder %s920_s26, %s915_s1 }
  0x2a   : > { %p918_p10 = pnand %p917_p9, %p916_p8 }
  0x2b   : > { %p923_p2 = por %p922_p0, %p921_p11 }
  0x2c   : > { %p919_p13 = pneg %p918_p10 }
  0x2e   : > { %p924_p5 = pnand %p923_p2, %p919_p13 }
  0x30   : > { %927 = shalt.err (!%p924_p5)
}
  0x31   : > { %737 = dma.hbm_to_vmem [thread:$0]  (!%p1163_p7), %s270_s9, 256, %s272_s8, %s259_s13  }
  0x32   : > { %280 = sbr.rel (%p1091_p3) target bundleno = 646 (0x286), region = 44  ;;  %s1180_s14 = sand.u32 (!%p1091_p3), 1, %s1009_s22  }
  0x33   : > { %s690_s30 = sshll.u32 (!%p1091_p3), %s1180_s14, 4  ;;  %s283_s7 = scalar_lea.sflag (!%p1091_p3), [#allocation3], %s1180_s14 }
  0x34   : > { %s1184_s20 = scalar_lea.vmem (!%p1091_p3), [#allocation2], %s690_s30 }
  0x37   : > { %988 = dma.done.wait (%p1142_p12), %s283_s7, 256  }
  0x38   : > { %990 = vsyncadd (%p1142_p12), %s283_s7, 4294967040 }
  0x39   : > { %992 = dma.done.wait (%p45_p1), [#allocation6], 8192  }
  0x3a   : > { %994 = vsyncadd (%p45_p1), [#allocation6], 4294959104 }
  0x3b   : > { %996 = dma.done.wait (%p45_p1), [#allocation9], 2240  }
  0x3c   : > { %998 = vsyncadd (%p45_p1), [#allocation9], 4294965056  ;;  %v354_v0 = vld [vmem:[#allocation5 + $0x78] sm:$0xff]  ;;  %v353_v1 = vld [vmem:[#allocation5 + $0x70] sm:$0xff]  ;;  %s695_s1 = sshll.u32 %s1180_s14, 3  ;;  %s697_s29 = sshll.u32 %s1086_s28, 3 }
  0x3d   : > { %v370_v2 = vld [vmem:[#allocation5 + $0xf8] sm:$0xff]  ;;  %372 = vmatpush.msra.mxu0 %v354_v0  ;;  %v369_v3 = vld [vmem:[#allocation5 + $0xf0] sm:$0xff]  ;;  %v352_v4 = vld [vmem:[#allocation5 + $0x68] sm:$0xff]  ;;  %s566_s9 = scalar_lea.hbm %s1243_s6, %s697_s29  ;;  %s335_s16 = scalar_lea.vmem [#allocation11], %s695_s1 }
  0x3e   : > { %392 = vmatpush.msra.mxu1 %v370_v2  ;;  %v368_v5 = vld [vmem:[#allocation5 + $0xe8] sm:$0xff]  ;;  %v351_v6 = vld [vmem:[#allocation5 + $0x60] sm:$0xff]  ;;  %v350_v8 = vld [vmem:[#allocation5 + $0x58] sm:$0xff]  ;;  %s568_s25 = sshll.u32 %s335_s16, 4  ;;  %s570_s26 = sshll.u32 %s566_s9, 4  ;;  %s569_s25 = int_to_ptr.vmem [resolvable:$true] %s568_s25  ;;  %s571_s26 = int_to_ptr.hbm [resolvable:$true] %s570_s26 }
  0x3f   : > { %373 = vmatpush.msra.mxu0 %v353_v1  ;;  %v367_v7 = vld [vmem:[#allocation5 + $0xe0] sm:$0xff]  ;;  %v366_v9 = vld [vmem:[#allocation5 + $0xd8] sm:$0xff]  ;;  %v349_v10 = vld [vmem:[#allocation5 + $0x50] sm:$0xff]  ;;  %s556_s27 = scalar_lea.sflag [#allocation4], %s1180_s14  ;;  %s957_s18 = sshra.s32 %s571_s26, 4  ;;  %s958_s18 = int_to_ptr.hbm [resolvable:$true] %s957_s18 }
  0x40   : > { %393 = vmatpush.msra.mxu1 %v369_v3  ;;  %v365_v11 = vld [vmem:[#allocation5 + $0xd0] sm:$0xff]  ;;  %v348_v12 = vld [vmem:[#allocation5 + $0x48] sm:$0xff]  ;;  %v436_v14 = vld [vmem:[#allocation7 + $0x78] sm:$0xff]  ;;  %s959_s28 = scalar_lea.hbm %s958_s18, 8  ;;  %p964_p12 = scmp.lt.s32.totalorder %s958_s18, %s1243_s6 }
  0x41   : > { %374 = vmatpush.msra.mxu0 %v352_v4  ;;  %v364_v13 = vld [vmem:[#allocation5 + $0xc8] sm:$0xff]  ;;  %v435_v15 = vld [vmem:[#allocation7 + $0x70] sm:$0xff]  ;;  %v347_v16 = vld [vmem:[#allocation5 + $0x40] sm:$0xff]  ;;  %438 = vmatpush.msra.mxu2 %v436_v14  ;;  %p960_p1 = scmp.ne.s32.totalorder %s958_s18, %s959_s28 }
  0x42   : > { %394 = vmatpush.msra.mxu1 %v368_v5  ;;  %v363_v17 = vld [vmem:[#allocation5 + $0xc0] sm:$0xff]  ;;  %v434_v18 = vld [vmem:[#allocation7 + $0x68] sm:$0xff]  ;;  %v346_v19 = vld [vmem:[#allocation5 + $0x38] sm:$0xff] }
  0x43   : > { %375 = vmatpush.msra.mxu0 %v351_v6  ;;  %v362_v20 = vld [vmem:[#allocation5 + $0xb8] sm:$0xff]  ;;  %439 = vmatpush.msra.mxu2 %v435_v15  ;;  %v433_v21 = vld [vmem:[#allocation7 + $0x60] sm:$0xff]  ;;  %v345_v22 = vld [vmem:[#allocation5 + $0x30] sm:$0xff]  ;;  %p961_p3 = pnand %p960_p1, %p1149_p4 }
  0x44   : > { %395 = vmatpush.msra.mxu1 %v367_v7  ;;  %v361_v23 = vld [vmem:[#allocation5 + $0xb0] sm:$0xff]  ;;  %v432_v24 = vld [vmem:[#allocation7 + $0x58] sm:$0xff]  ;;  %v344_v25 = vld [vmem:[#allocation5 + $0x28] sm:$0xff] }
  0x45   : > { %376 = vmatpush.msra.mxu0 %v350_v8  ;;  %440 = vmatpush.msra.mxu2 %v434_v18  ;;  %v360_v26 = vld [vmem:[#allocation5 + $0xa8] sm:$0xff]  ;;  %v431_v27 = vld [vmem:[#allocation7 + $0x50] sm:$0xff]  ;;  %v343_v28 = vld [vmem:[#allocation5 + $0x20] sm:$0xff]  ;;  %p962_p5 = pneg %p961_p3 }
  0x46   : > { %396 = vmatpush.msra.mxu1 %v366_v9  ;;  %v359_v29 = vld [vmem:[#allocation5 + $0xa0] sm:$0xff]  ;;  %v430_v30 = vld [vmem:[#allocation7 + $0x48] sm:$0xff]  ;;  %v342_v31 = vld [vmem:[#allocation5 + $0x18] sm:$0xff] }
  0x47   : > { %377 = vmatpush.msra.mxu0 %v349_v10  ;;  %441 = vmatpush.msra.mxu2 %v433_v21  ;;  %v358_v32 = vld [vmem:[#allocation5 + $0x98] sm:$0xff]  ;;  %v429_v33 = vld [vmem:[#allocation7 + $0x40] sm:$0xff]  ;;  %v341_v34 = vld [vmem:[#allocation5 + $0x10] sm:$0xff] }
  0x48   : > { %397 = vmatpush.msra.mxu1 %v365_v11  ;;  %v357_v35 = vld [vmem:[#allocation5 + $0x90] sm:$0xff]  ;;  %v428_v36 = vld [vmem:[#allocation7 + $0x38] sm:$0xff]  ;;  %v340_v37 = vld [vmem:[#allocation5 + $0x8] sm:$0xff] }
  0x49   : > { %378 = vmatpush.msra.mxu0 %v348_v12  ;;  %442 = vmatpush.msra.mxu2 %v432_v24  ;;  %v356_v38 = vld [vmem:[#allocation5 + $0x88] sm:$0xff]  ;;  %v427_v39 = vld [vmem:[#allocation7 + $0x30] sm:$0xff]  ;;  %v339_v40 = vld [vmem:[#allocation5] sm:$0xff] }
  0x4a   : > { %398 = vmatpush.msra.mxu1 %v364_v13  ;;  %v355_v41 = vld [vmem:[#allocation5 + $0x80] sm:$0xff]  ;;  %v337_v43 = vld [vmem:[%s1184_s20 + $0x8] sm:$0xff]  ;;  %v423_v47 = vld [vmem:[#allocation7 + $0x10] sm:$0xff] }
  0x4b   : > { %379 = vmatpush.msra.mxu0 %v347_v16  ;;  %443 = vmatpush.msra.mxu2 %v431_v27  ;;  %v336_v42 = vld [vmem:[%s1184_s20] sm:$0xff]  ;;  %v426_v44 = vld [vmem:[#allocation7 + $0x28] sm:$0xff]  ;;  %v424_v46 = vld [vmem:[#allocation7 + $0x18] sm:$0xff]  ;;  %s963_s20 = scalar_lea.hbm %s1243_s6, 16 }
  0x4c   : > { %399 = vmatpush.msra.mxu1 %v363_v17  ;;  %v425_v45 = vld [vmem:[#allocation7 + $0x20] sm:$0xff]  ;;  %v422_v48 = vld [vmem:[#allocation7 + $0x8] sm:$0xff]  ;;  %v484_v50 = vld [vmem:[#allocation7 + $0xf8] sm:$0xff]  ;;  %p965_p7 = scmp.lt.s32.totalorder %s963_s20, %s959_s28 }
  0x4d   : > { %380 = vmatpush.msra.mxu0 %v346_v19  ;;  %444 = vmatpush.msra.mxu2 %v430_v30  ;;  %v421_v49 = vld [vmem:[#allocation7] sm:$0xff]  ;;  %v483_v51 = vld [vmem:[#allocation7 + $0xf0] sm:$0xff]  ;;  %v482_v52 = vld [vmem:[#allocation7 + $0xe8] sm:$0xff] }
  0x4e   : > { %400 = vmatpush.msra.mxu1 %v362_v20  ;;  %486 = vmatpush.msra.mxu3 %v484_v50  ;;  %v481_v53 = vld [vmem:[#allocation7 + $0xe0] sm:$0xff]  ;;  %v480_v54 = vld [vmem:[#allocation7 + $0xd8] sm:$0xff]  ;;  %v479_v55 = vld [vmem:[#allocation7 + $0xd0] sm:$0xff]  ;;  %p966_p8 = por %p965_p7, %p964_p12 }
  0x4f   : > { %381 = vmatpush.msra.mxu0 %v345_v22  ;;  %445 = vmatpush.msra.mxu2 %v429_v33  ;;  %v478_v56 = vld [vmem:[#allocation7 + $0xc8] sm:$0xff]  ;;  %v477_v57 = vld [vmem:[#allocation7 + $0xc0] sm:$0xff]  ;;  %v476_v59 = vld [vmem:[#allocation7 + $0xb8] sm:$0xff] }
  0x50   : > { %401 = vmatpush.msra.mxu1 %v361_v23  ;;  %487 = vmatpush.msra.mxu3 %v483_v51  ;;  %v338_v58 = vld [vmem:[#allocation8] sm:$0x7]  ;;  %v475_v60 = vld [vmem:[#allocation7 + $0xb0] sm:$0xff]  ;;  %v474_v8 = vld [vmem:[#allocation7 + $0xa8] sm:$0xff]  ;;  %p967_p9 = pnand %p966_p8, %p962_p5 }
  0x51   : > { %382 = vmatpush.msra.mxu0 %v344_v25  ;;  %446 = vmatpush.msra.mxu2 %v428_v36  ;;  %v371_v61 = vperm.slane %v338_v58, 0  ;;  %v415_v2 = vperm.slane %v338_v58, 1  ;;  %v417_v4 = vperm.slane %v338_v58, 2  ;;  %v473_v9 = vld [vmem:[#allocation7 + $0xa0] sm:$0xff]  ;;  %v472_v10 = vld [vmem:[#allocation7 + $0x98] sm:$0xff]  ;;  %v471_v11 = vld [vmem:[#allocation7 + $0x90] sm:$0xff] }
  0x52   : > { %402 = vmatpush.msra.mxu1 %v360_v26  ;;  %488 = vmatpush.msra.mxu3 %v482_v52  ;;  %v470_v12 = vld [vmem:[#allocation7 + $0x88] sm:$0xff]  ;;  %v469_v13 = vld [vmem:[#allocation7 + $0x80] sm:$0xff]  ;;  %v527_v16 = vld [vmem:[#allocation10 + $0x68] sm:$0xff] }
  0x53   : > { %383 = vmatpush.msra.mxu0 %v343_v28  ;;  %447 = vmatpush.msra.mxu2 %v427_v39  ;;  %v529_v14 = vld [vmem:[#allocation10 + $0x78] sm:$0xff]  ;;  %v528_v15 = vld [vmem:[#allocation10 + $0x70] sm:$0xff]  ;;  %v526_v17 = vld [vmem:[#allocation10 + $0x60] sm:$0xff] }
  0x54   : > { %403 = vmatpush.msra.mxu1 %v359_v29  ;;  %489 = vmatpush.msra.mxu3 %v481_v53  ;;  %v525_v18 = vld [vmem:[#allocation10 + $0x58] sm:$0xff]  ;;  %v524_v19 = vld [vmem:[#allocation10 + $0x50] sm:$0xff]  ;;  %v523_v20 = vld [vmem:[#allocation10 + $0x48] sm:$0xff] }
  0x55   : > { %384 = vmatpush.msra.mxu0 %v342_v31  ;;  %448 = vmatpush.msra.mxu2 %v426_v44  ;;  %v522_v21 = vld [vmem:[#allocation10 + $0x40] sm:$0xff]  ;;  %v420_v22 = vld [vmem:[#allocation8 + $0x4] sm:$0x7]  ;;  %v520_v24 = vld [vmem:[#allocation10 + $0x30] sm:$0xff] }
  0x56   : > { %404 = vmatpush.msra.mxu1 %v358_v32  ;;  %490 = vmatpush.msra.mxu3 %v480_v54  ;;  %v521_v23 = vld [vmem:[#allocation10 + $0x38] sm:$0xff]  ;;  %v437_v25 = vperm.slane %v420_v22, 0  ;;  %v462_v29 = vperm.slane %v420_v22, 1  ;;  %v464_v32 = vperm.slane %v420_v22, 2  ;;  %v518_v36 = vld [vmem:[#allocation10 + $0x20] sm:$0xff]  ;;  %v515_v39 = vld [vmem:[#allocation10 + $0x8] sm:$0xff] }
  0x57   : > { %385 = vmatpush.msra.mxu0 %v341_v34  ;;  %449 = vmatpush.msra.mxu2 %v425_v45  ;;  %v792_v52 = vld [vmem:[%s1242_s5] ss:$0 sm:$0xff] }
  0x58   : > { %405 = vmatpush.msra.mxu1 %v357_v35  ;;  %491 = vmatpush.msra.mxu3 %v479_v55  ;;  %v519_v35 = vld [vmem:[#allocation10 + $0x28] sm:$0xff] }
  0x59   : > { %386 = vmatpush.msra.mxu0 %v340_v37  ;;  %450 = vmatpush.msra.mxu2 %v424_v46  ;;  %v517_v37 = vld [vmem:[#allocation10 + $0x18] sm:$0xff] }
  0x5a   : > { %406 = vmatpush.msra.mxu1 %v356_v38  ;;  %492 = vmatpush.msra.mxu3 %v478_v56  ;;  %v516_v38 = vld [vmem:[#allocation10 + $0x10] sm:$0xff] }
  0x5b   : > { %387 = vmatpush.msra.mxu0 %v339_v40  ;;  %451 = vmatpush.msra.mxu2 %v423_v47  ;;  %v514_v40 = vld [vmem:[#allocation10] sm:$0xff] }
  0x5c   : > { %407 = vmatpush.msra.mxu1 %v355_v41  ;;  %388 = vmatmul.f32.vlgmr.msra.gmra.mxu0 %v336_v42  ;;  %v467_v41 = vld [vmem:[#allocation8 + $0x8] sm:$0x7] }
  0x5d   : > { %408 = vmatmul.f32.vlgmr.msra.gmra.mxu1 %v337_v43  ;;  %452 = vmatpush.msra.mxu2 %v422_v48  ;;  %v485_v42 = vperm.slane %v467_v41, 0  ;;  %v510_v46 = vperm.slane %v467_v41, 1 }
  0x5e   : > { %493 = vmatpush.msra.mxu3 %v477_v57  ;;  %534 = vmatpush.msrb.mxu0 %v529_v14 }
  0x5f   : > { %453 = vmatpush.msra.mxu2 %v421_v49  ;;  %v512_v49 = vperm.slane %v467_v41, 2 }
  0x60   : > { %494 = vmatpush.msra.mxu3 %v476_v59  ;;  %535 = vmatpush.msrb.mxu0 %v528_v15 }
  0x62   : > { %495 = vmatpush.msra.mxu3 %v475_v60  ;;  %536 = vmatpush.msrb.mxu0 %v527_v16 }
  0x64   : > { %496 = vmatpush.msra.mxu3 %v474_v8  ;;  %537 = vmatpush.msrb.mxu0 %v526_v17 }
  0x66   : > { %497 = vmatpush.msra.mxu3 %v473_v9  ;;  %538 = vmatpush.msrb.mxu0 %v525_v18 }
  0x68   : > { %498 = vmatpush.msra.mxu3 %v472_v10  ;;  %539 = vmatpush.msrb.mxu0 %v524_v19 }
  0x6a   : > { %499 = vmatpush.msra.mxu3 %v471_v11  ;;  %540 = vmatpush.msrb.mxu0 %v523_v20 }
  0x6c   : > { %500 = vmatpush.msra.mxu3 %v470_v12  ;;  %541 = vmatpush.msrb.mxu0 %v522_v21 }
  0x6e   : > { %501 = vmatpush.msra.mxu3 %v469_v13  ;;  %542 = vmatpush.msrb.mxu0 %v521_v23 }
  0x70   : > { %543 = vmatpush.msrb.mxu0 %v520_v24 }
  0x72   : > { %544 = vmatpush.msrb.mxu0 %v519_v35 }
  0x74   : > { %545 = vmatpush.msrb.mxu0 %v518_v36 }
  0x76   : > { %546 = vmatpush.msrb.mxu0 %v517_v37 }
  0x78   : > { %547 = vmatpush.msrb.mxu0 %v516_v38 }
  0x7a   : > { %548 = vmatpush.msrb.mxu0 %v515_v39 }
  0x7c   : > { %549 = vmatpush.msrb.mxu0 %v514_v40 }
  0xd9   : > { %v389_v62 = vpop.f32.mrf.mxu0 }
  0xda   : > { %v409_v63 = vpop.f32.mrf.mxu1  ;;  %v390_v0 = vadd.f32 %v389_v62, %v371_v61 }
  0xdc   : > { %v410_v1 = vadd.f32 %v409_v63, %v390_v0 }
  0xde   : > { %vm412_vm0 = vcmp.gt.f32.partialorder %v410_v1, 0.0  ;;  %v413_v3 = vmul.f32 0.01, %v410_v1 }
  0xe0   : > { %v414_v5 = vsel %vm412_vm0, %v410_v1, %v413_v3 }
  0xe1   : > { %v416_v6 = vmul.f32 %v415_v2, %v414_v5 }
  0xe3   : > { %v418_v7 = vadd.f32 %v417_v4, %v416_v6 }
  0xe5   : > { %454 = vmatmul.f32.vlgmr.msra.gmra.mxu2 %v418_v7 }
 0x168   : > { %v455_v26 = vpop.f32.mrf.mxu2 }
 0x169   : > { %v456_v27 = vadd.f32 %v455_v26, %v437_v25 }
 0x16b   : > { %vm458_vm1 = vcmp.gt.f32.partialorder %v456_v27, 0.0  ;;  %v459_v28 = vmul.f32 0.01, %v456_v27 }
 0x16d   : > { %v460_v30 = vsel %vm458_vm1, %v456_v27, %v459_v28 }
 0x16e   : > { %v461_v31 = vadd.f32 %v460_v30, %v418_v7 }
 0x170   : > { %v463_v33 = vmul.f32 %v462_v29, %v461_v31 }
 0x172   : > { %v465_v34 = vadd.f32 %v464_v32, %v463_v33 }
 0x174   : > { %502 = vmatmul.f32.vlgmr.msra.gmra.mxu3 %v465_v34 }
 0x1f7   : > { %v503_v43 = vpop.f32.mrf.mxu3 }
 0x1f8   : > { %v504_v44 = vadd.f32 %v503_v43, %v485_v42 }
 0x1fa   : > { %vm506_vm2 = vcmp.gt.f32.partialorder %v504_v44, 0.0  ;;  %v507_v45 = vmul.f32 0.01, %v504_v44 }
 0x1fc   : > { %v508_v47 = vsel %vm506_vm2, %v504_v44, %v507_v45 }
 0x1fd   : > { %v509_v48 = vadd.f32 %v508_v47, %v465_v34 }
 0x1ff   : > { %v511_v50 = vmul.f32 %v510_v46, %v509_v48 }
 0x201   : > { %v513_v51 = vadd.f32 %v512_v49, %v511_v50 }
 0x203   : > { %550 = vmatmul.f32.vlgmr.msrb.gmra.mxu0 %v513_v51 }
 0x280   : > { %v551_v53 = vpop.f32.mrf.mxu0 }
 0x281   : > { %v552_v54 = vadd.f32 %v792_v52, %v551_v53 }
 0x283   : > { %554 = vst [vmem:[%s335_s16] sm:$0xff] %v552_v54 }
 0x284   : > { %970 = shalt.err (!%p967_p9)
}
 0x285   : > { %719 = dma.vmem_to_hbm [thread:$0]  (%p1149_p4), %s569_s25, 128, %s571_s26, %s556_s27  }
 0x286 PF: > { %s582_s14 = sand.u32 1, %s1005_s21   ;;  %p1253_p10 = scmp.ge.s32.totalorder %s1017_s24, 2 }
 0x287   : > { %s583_s11 = scalar_lea.sflag [#allocation4], %s582_s14 }
 0x288   : > { %p739_p13 = pnand %p1253_p10, %p1153_p6 }
 0x28a   : > { %p740_p11 = pneg %p739_p13 }
 0x28c   : > { %1000 = dma.done.wait (%p740_p11), %s583_s11, 128  }
 0x28d   : > { %1002 = vsyncadd (%p740_p11), %s583_s11, 4294967168  ;;  %p21_p0 = scmp.ge.s32.totalorder %s1123_s12, 4   ;;  %s1254_s21 = smov %s1009_s22 }
 0x28e   : > { %s1255_s22 = smov %s1013_s23  ;;  %s1256_s23 = smov %s1134_s17 }
 0x28f   : > { %s1257_s24 = smov %s1123_s12  ;;  %23 = sbr.rel (!%p21_p0) target bundleno = 9 (0x9), region = 108 }
 0x294   :  { %589 = vsyncpa [#allocation3], 1 }
 0x295   :  { %591 = vsyncpa [#allocation3 + $0x1], 1 }
 0x296   :  { %592 = vsyncpa [#allocation6], 1 }
 0x297   :  { %593 = vsyncpa [#allocation9], 1 }
 0x298   :  { %594 = vsyncpa [#allocation4], 1 }
 0x299   :  { %596 = vsyncpa [#allocation4 + $0x1], 1 }

</bundles_post_ra>
